<compile_context>
chip_gen: v6e
topology: v6e:2x2x1
jax: 0.10.0
libtpu: 0.0.40
codegen_flags: <defaults>
</compile_context>

<pallas_src>
import functools

import jax
import jax.numpy as jnp
from jax import lax
from jax.experimental import pallas as pl
from jax.experimental.pallas import tpu as pltpu

EPS = 1e-6


def _round_up(x, m):
    return (x + m - 1) // m * m


def _cdiv(a, b):
    return (a + b - 1) // b


def _embed_ln_kernel(p_ref, w_ref, b_ref, g_ref, beta_ref, o_ref, *, hidden):
    # p_ref    : (K, tile)       transposed flattened patches (compute dtype)
    # w_ref    : (hidden, K)     conv weight as matmul LHS    (compute dtype)
    # b_ref    : (hidden, 1)     conv bias       (f32)
    # g_ref    : (hidden, 1)     LayerNorm gamma (f32)
    # beta_ref : (hidden, 1)     LayerNorm beta  (f32)
    # o_ref    : (hidden, tile)  output, already channels-first

    # Patch-embedding conv == MXU matmul, f32 accumulate; columns = patch positions.
    x = jnp.dot(w_ref[...], p_ref[...], preferred_element_type=jnp.float32)
    x = x + b_ref[...]

    # channels_first LayerNorm over `hidden` (the sublane axis), in f32.
    # Single pass: var = E[x^2] - mean^2, clamped at 0 for fp safety (biased
    # variance, eps added before rsqrt — matches the module's forward).
    inv_h = jnp.float32(1.0 / hidden)
    mean = jnp.sum(x, axis=0, keepdims=True) * inv_h
    ex2 = jnp.sum(x * x, axis=0, keepdims=True) * inv_h
    var = jnp.maximum(ex2 - mean * mean, 0.0)
    y = (x - mean) * lax.rsqrt(var + EPS)                # EUP rsqrt, no divide

    # Affine in f32, single cast at the store. For f32 activations this is exactly
    # the module; for bf16 activations it differs from the module's
    # cast-then-affine by one rounding step (per review, preferred on v5e).
    o_ref[...] = (g_ref[...] * y + beta_ref[...]).astype(o_ref.dtype)


def convnext_embeddings(pixel_values, conv_w, conv_b, ln_w, ln_b, patch_size, *,
                        tile_cols=1024,
                        compute_dtype=jnp.bfloat16,
                        vmem_budget_bytes=16 * 1024 * 1024):
    """pixel_values: (N, C, H, W) -> (N, hidden, H//p, W//p)  (NCHW, like PyTorch)."""
    N, C, H, W = pixel_values.shape
    hidden = conv_w.shape[0]
    p = patch_size
    assert H % p == 0 and W % p == 0
    Hp, Wp = H // p, W // p
    HW = Hp * Wp
    K = C * p * p
    out_dtype = pixel_values.dtype

    # --- input glue (the only HBM round trip outside the kernel): cast to the
    # compute dtype FIRST so the transpose moves 2 bytes/elem, then flatten the
    # non-overlapping patches into channels-first (K, spatial) order.
    # TODO(synk): move patch extraction fully into the kernel (BlockSpec over the
    # raw NCHW input + strided lane slices) to remove this last input round trip.
    x = pixel_values.astype(compute_dtype)
    x = x.reshape(N, C, Hp, p, Wp, p)
    x = jnp.transpose(x, (0, 1, 3, 5, 2, 4))             # (N, C, p, p, Hp, Wp)
    patches_t = x.reshape(N, K, HW)                       # (N, K, HW)

    # Parameters: channels-first, hidden on sublanes -> no 128-padding anywhere.
    w_mat = conv_w.reshape(hidden, K).astype(compute_dtype)       # (hidden, K)
    b_col = conv_b.reshape(hidden, 1).astype(jnp.float32)
    g_col = ln_w.reshape(hidden, 1).astype(jnp.float32)
    beta_col = ln_b.reshape(hidden, 1).astype(jnp.float32)

    # --- VMEM accounting (review: include lane padding + f32 LN intermediates) ---
    in_bytes = jnp.dtype(compute_dtype).itemsize
    out_bytes = jnp.dtype(out_dtype).itemsize
    sub_in = {4: 8, 2: 16, 1: 32}.get(in_bytes, 8)        # sublane packing of inputs
    k_sub = _round_up(K, sub_in)
    hid8 = _round_up(hidden, 8)

    def vmem_est(t):
        lanes = _round_up(t, 128)
        in_blk = k_sub * lanes * in_bytes                  # (K, t) patch block
        out_blk = hid8 * lanes * out_bytes                 # (hidden, t) output block
        ln_tmp = 3 * hid8 * lanes * 4                      # x / centered / y in f32
        params = (_round_up(hidden, sub_in) * _round_up(K, 128) * in_bytes
                  + 3 * hid8 * 128 * 4)                    # weight + 3 column params
        return 2 * (in_blk + out_blk + params) + ln_tmp    # double-buffered I/O

    # --- spatial tile: large (amortizes ~0.35us/grid-step), a multiple of 128 or
    # the full HW extent; clamped to the VMEM budget.  No padding of the spatial
    # axis: grid uses cdiv and the ragged tail is handled by OOB-store discard
    # (columns are independent — no cross-column reduction anywhere).
    tr = HW if HW <= tile_cols else max(128, (tile_cols // 128) * 128)
    while tr > 128 and vmem_est(tr) > vmem_budget_bytes:
        tr = max(128, ((tr // 2) // 128) * 128)
    # v7x megacore: guarantee >= 2 grid steps so both TensorCores get work.
    if N * _cdiv(HW, tr) < 2 and HW > 128:
        tr = min(tr, _round_up(_cdiv(HW, 2), 128))

    grid = (N, _cdiv(HW, tr))
    vmem_limit = int(min(max(2 * vmem_est(tr), 24 * 1024 * 1024),
                         40 * 1024 * 1024))

    kernel = functools.partial(_embed_ln_kernel, hidden=hidden)

    out = pl.pallas_call(
        kernel,
        out_shape=jax.ShapeDtypeStruct((N, hidden, HW), out_dtype),
        grid_spec=pltpu.PrefetchScalarGridSpec(
            num_scalar_prefetch=0,
            grid=grid,
            in_specs=[
                pl.BlockSpec((None, K, tr), lambda n, j: (n, 0, j)),
                pl.BlockSpec((hidden, K), lambda n, j: (0, 0)),
                pl.BlockSpec((hidden, 1), lambda n, j: (0, 0)),
                pl.BlockSpec((hidden, 1), lambda n, j: (0, 0)),
                pl.BlockSpec((hidden, 1), lambda n, j: (0, 0)),
            ],
            out_specs=pl.BlockSpec((None, hidden, tr), lambda n, j: (n, 0, j)),
        ),
        compiler_params=pltpu.CompilerParams(
            dimension_semantics=("parallel", "parallel"),
            vmem_limit_bytes=vmem_limit,
        ),
    )(patches_t, w_mat, b_col, g_col, beta_col)

    # Output is already channels-first: this reshape is metadata-only (no copy,
    # no slice, no transpose) -> module-matching NCHW.
    return out.reshape(N, hidden, Hp, Wp)


def _reference(pixel_values, conv_w, conv_b, ln_w, ln_b, patch_size, conv_dtype=None):
    """Pure-JAX reference: patch conv + channels_first LayerNorm (module semantics).
    conv_dtype lets us mirror the kernel's bf16-operand matmul for a tight check."""
    out_dtype = pixel_values.dtype
    x_in, w_in = pixel_values, conv_w
    if conv_dtype is not None:
        x_in, w_in = x_in.astype(conv_dtype), w_in.astype(conv_dtype)
    conv = lax.conv_general_dilated(
        x_in, w_in,
        window_strides=(patch_size, patch_size), padding="VALID",
        dimension_numbers=("NCHW", "OIHW", "NCHW"),
        preferred_element_type=jnp.float32,
    ) + conv_b[None, :, None, None].astype(jnp.float32)
    x = conv.astype(jnp.float32)
    u = jnp.mean(x, axis=1, keepdims=True)
    s = jnp.mean((x - u) ** 2, axis=1, keepdims=True)
    x = (x - u) / jnp.sqrt(s + EPS)
    x = x.astype(out_dtype)
    return ln_w[None, :, None, None] * x + ln_b[None, :, None, None]


if __name__ == "__main__":
    # Small synthetic config: num_channels=4, patch_size=4, hidden_sizes[0]=32
    N, C, H, W = 2, 4, 16, 16
    patch_size = 4
    hidden = 32

    key = jax.random.PRNGKey(0)
    k_x, k_w, k_b = jax.random.split(key, 3)

    pixel_values = jax.random.normal(k_x, (N, C, H, W), dtype=jnp.float32)
    conv_w = jax.random.normal(k_w, (hidden, C, patch_size, patch_size),
                               dtype=jnp.float32) * 0.05
    conv_b = jax.random.normal(k_b, (hidden,), dtype=jnp.float32) * 0.05
    ln_w = jnp.ones((hidden,), dtype=jnp.float32)   # ConvNextLayerNorm init: ones
    ln_b = jnp.zeros((hidden,), dtype=jnp.float32)  # ConvNextLayerNorm init: zeros

    # Default (fast) path: bf16 MXU operands, f32 accumulate, f32 LayerNorm.
    out = convnext_embeddings(pixel_values, conv_w, conv_b, ln_w, ln_b, patch_size)
    out = jax.block_until_ready(out)
    assert out.shape == (N, hidden, H // patch_size, W // patch_size)

    # Tight check vs. a reference that uses the same bf16 conv operands.
    ref_bf16 = _reference(pixel_values, conv_w, conv_b, ln_w, ln_b, patch_size,
                          conv_dtype=jnp.bfloat16)
    assert jnp.allclose(out, ref_bf16, atol=2e-3, rtol=2e-3)

    # Loose check vs. the exact f32 module semantics (difference = bf16 matmul rounding).
    ref_f32 = _reference(pixel_values, conv_w, conv_b, ln_w, ln_b, patch_size)
    assert jnp.allclose(out, ref_f32, atol=3e-2, rtol=3e-2)

    # f32-operand path reproduces the module reference to tight tolerance
    # (shows the channels-first LayerNorm / single-pass variance is numerically exact).
    out_f32 = convnext_embeddings(pixel_values, conv_w, conv_b, ln_w, ln_b, patch_size,
                                  compute_dtype=jnp.float32)
    out_f32 = jax.block_until_ready(out_f32)
    assert jnp.allclose(out_f32, ref_f32, atol=1e-4, rtol=1e-4)

    print("KERNEL_OK")
</pallas_src>

<mosaic_0001>
module attributes {stable_mosaic.version = 11 : i64} {
  func.func @_embed_ln_kernel(%arg0: i32, %arg1: i32, %arg2: memref<1x64x16xbf16, #tpu.memory_space<vmem>>, %arg3: memref<32x64xbf16, #tpu.memory_space<vmem>>, %arg4: memref<32x1xf32, #tpu.memory_space<vmem>>, %arg5: memref<32x1xf32, #tpu.memory_space<vmem>>, %arg6: memref<32x1xf32, #tpu.memory_space<vmem>>, %arg7: memref<1x32x16xf32, #tpu.memory_space<vmem>>) attributes {dimension_semantics = [#tpu.dimension_semantics<parallel>, #tpu.dimension_semantics<parallel>], iteration_bounds = array<i64: 2, 1>, scalar_prefetch = 0 : i64, scratch_operands = 0 : i64, tpu.core_type = #tpu.core_type<tc>, window_params = [{transform_indices = @transform_0, window_bounds = array<i64: 1, 64, 16>}, {pipeline_mode = #tpu.pipeline_mode<synchronous>, transform_indices = @transform_1, window_bounds = array<i64: 32, 64>}, {pipeline_mode = #tpu.pipeline_mode<synchronous>, transform_indices = @transform_2, window_bounds = array<i64: 32, 1>}, {pipeline_mode = #tpu.pipeline_mode<synchronous>, transform_indices = @transform_3, window_bounds = array<i64: 32, 1>}, {pipeline_mode = #tpu.pipeline_mode<synchronous>, transform_indices = @transform_4, window_bounds = array<i64: 32, 1>}, {transform_indices = @transform_5, window_bounds = array<i64: 1, 32, 16>}]} {
    %c0 = arith.constant 0 : index
    %c0_0 = arith.constant 0 : index
    %0 = vector.load %arg3[%c0, %c0_0] : memref<32x64xbf16, #tpu.memory_space<vmem>>, vector<32x64xbf16>
    %c0_1 = arith.constant 0 : index
    %c0_2 = arith.constant 0 : index
    %c0_3 = arith.constant 0 : index
    %1 = vector.load %arg2[%c0_1, %c0_2, %c0_3] : memref<1x64x16xbf16, #tpu.memory_space<vmem>>, vector<1x64x16xbf16>
    %2 = vector.shape_cast %1 : vector<1x64x16xbf16> to vector<64x16xbf16>
    %cst = arith.constant dense<0.000000e+00> : vector<32x16xf32>
    %3 = tpu.matmul %0, %2, %cst {dimension_numbers = #tpu.dot_dimension_numbers<[1], [0], [0], [1], [0, 0, 1, 1], [], []>} : vector<32x64xbf16>, vector<64x16xbf16>, vector<32x16xf32> -> vector<32x16xf32>
    %c0_4 = arith.constant 0 : index
    %c0_5 = arith.constant 0 : index
    %4 = vector.load %arg4[%c0_4, %c0_5] : memref<32x1xf32, #tpu.memory_space<vmem>>, vector<32x1xf32>
    %5 = vector.broadcast %4 : vector<32x1xf32> to vector<32x16xf32>
    %6 = arith.addf %3, %5 : vector<32x16xf32>
    %cst_6 = arith.constant dense<0.000000e+00> : vector<16xf32>
    %7 = vector.multi_reduction <add>, %6, %cst_6 [0] : vector<32x16xf32> to vector<16xf32>
    %8 = vector.shape_cast %7 : vector<16xf32> to vector<1x16xf32>
    %cst_7 = arith.constant 3.125000e-02 : f32
    %9 = vector.broadcast %cst_7 : f32 to vector<1x16xf32>
    %10 = arith.mulf %8, %9 : vector<1x16xf32>
    %11 = arith.mulf %6, %6 : vector<32x16xf32>
    %cst_8 = arith.constant dense<0.000000e+00> : vector<16xf32>
    %12 = vector.multi_reduction <add>, %11, %cst_8 [0] : vector<32x16xf32> to vector<16xf32>
    %13 = vector.shape_cast %12 : vector<16xf32> to vector<1x16xf32>
    %cst_9 = arith.constant 3.125000e-02 : f32
    %14 = vector.broadcast %cst_9 : f32 to vector<1x16xf32>
    %15 = arith.mulf %13, %14 : vector<1x16xf32>
    %16 = arith.mulf %10, %10 : vector<1x16xf32>
    %17 = arith.subf %15, %16 : vector<1x16xf32>
    %cst_10 = arith.constant 0.000000e+00 : f32
    %18 = vector.broadcast %cst_10 : f32 to vector<1x16xf32>
    %19 = arith.maximumf %17, %18 : vector<1x16xf32>
    %20 = vector.broadcast %10 : vector<1x16xf32> to vector<32x16xf32>
    %21 = arith.subf %6, %20 : vector<32x16xf32>
    %cst_11 = arith.constant 9.99999997E-7 : f32
    %22 = vector.broadcast %cst_11 : f32 to vector<1x16xf32>
    %23 = arith.addf %19, %22 : vector<1x16xf32>
    %24 = math.rsqrt %23 : vector<1x16xf32>
    %25 = vector.broadcast %24 : vector<1x16xf32> to vector<32x16xf32>
    %26 = arith.mulf %21, %25 : vector<32x16xf32>
    %c0_12 = arith.constant 0 : index
    %c0_13 = arith.constant 0 : index
    %27 = vector.load %arg5[%c0_12, %c0_13] : memref<32x1xf32, #tpu.memory_space<vmem>>, vector<32x1xf32>
    %28 = vector.broadcast %27 : vector<32x1xf32> to vector<32x16xf32>
    %29 = arith.mulf %28, %26 : vector<32x16xf32>
    %c0_14 = arith.constant 0 : index
    %c0_15 = arith.constant 0 : index
    %30 = vector.load %arg6[%c0_14, %c0_15] : memref<32x1xf32, #tpu.memory_space<vmem>>, vector<32x1xf32>
    %31 = vector.broadcast %30 : vector<32x1xf32> to vector<32x16xf32>
    %32 = arith.addf %29, %31 : vector<32x16xf32>
    %c0_16 = arith.constant 0 : index
    %c0_17 = arith.constant 0 : index
    %c0_18 = arith.constant 0 : index
    %33 = vector.load %arg7[%c0_16, %c0_17, %c0_18] : memref<1x32x16xf32, #tpu.memory_space<vmem>>, vector<1x32x16xf32>
    %34 = vector.shape_cast %33 : vector<1x32x16xf32> to vector<32x16xf32>
    %35 = vector.shape_cast %32 : vector<32x16xf32> to vector<1x32x16xf32>
    tpu.vector_store %arg7[%c0_16, %c0_17, %c0_18], %35 {strides = array<i32>} : memref<1x32x16xf32, #tpu.memory_space<vmem>>, vector<1x32x16xf32>,
    return
  }
  func.func @transform_0(%arg0: i32, %arg1: i32) -> (i32, i32, i32) {
    %c0_i32 = arith.constant 0 : i32
    %c0_i32_0 = arith.constant 0 : i32
    return %arg0, %c0_i32, %arg1 : i32, i32, i32
  }
  func.func @transform_1(%arg0: i32, %arg1: i32) -> (i32, i32) {
    %c0_i32 = arith.constant 0 : i32
    %c0_i32_0 = arith.constant 0 : i32
    %c0_i32_1 = arith.constant 0 : i32
    return %c0_i32, %c0_i32_0 : i32, i32
  }
  func.func @transform_2(%arg0: i32, %arg1: i32) -> (i32, i32) {
    %c0_i32 = arith.constant 0 : i32
    %c0_i32_0 = arith.constant 0 : i32
    %c0_i32_1 = arith.constant 0 : i32
    return %c0_i32, %c0_i32_0 : i32, i32
  }
  func.func @transform_3(%arg0: i32, %arg1: i32) -> (i32, i32) {
    %c0_i32 = arith.constant 0 : i32
    %c0_i32_0 = arith.constant 0 : i32
    %c0_i32_1 = arith.constant 0 : i32
    return %c0_i32, %c0_i32_0 : i32, i32
  }
  func.func @transform_4(%arg0: i32, %arg1: i32) -> (i32, i32) {
    %c0_i32 = arith.constant 0 : i32
    %c0_i32_0 = arith.constant 0 : i32
    %c0_i32_1 = arith.constant 0 : i32
    return %c0_i32, %c0_i32_0 : i32, i32
  }
  func.func @transform_5(%arg0: i32, %arg1: i32) -> (i32, i32, i32) {
    %c0_i32 = arith.constant 0 : i32
    %c0_i32_0 = arith.constant 0 : i32
    return %arg0, %c0_i32, %arg1 : i32, i32, i32
  }
}

</mosaic_0001>

<bundles_post_ra>
// kernel: tpu_custom_call.1
= control target key start
LH: loop header
LB: loop body
LE: loop exit
PB: predicated region body
PF: predicated region fallthrough
CT: control target
= control target key end

     0   :  { %s701_s18 = smov 0   ;;  %s703_s19 = smov 0   ;;  %s797_s0 = inlined_call_operand.vmem [shape: bf16[2,64,16], index: 0, kind: input, shape index: {}]   ;;  %s798_s1 = inlined_call_operand.vmem [shape: bf16[32,64], index: 1, kind: input, shape index: {}]   ;;  %s799_s2 = inlined_call_operand.vmem [shape: f32[32,1], index: 2, kind: input, shape index: {}]   ;;  %s800_s3 = inlined_call_operand.vmem [shape: f32[32,1], index: 3, kind: input, shape index: {}]   ;;  %s801_s4 = inlined_call_operand.vmem [shape: f32[32,1], index: 4, kind: input, shape index: {}]   ;;  %s802_s5 = inlined_call_operand.vmem [shape: f32[2,32,16], index: 5, kind: output, shape index: {}]  }
   0x1   :  { %s705_s20 = smov 0  }
   0x2 LB: > { %s27_s21 = sadd.s32 1, %s664_s19  ;;  %p576_p0 = scmp.ge.s32.totalorder %s668_s20, 1  ;;  %s668_s20 = sphi %s705_s20, %s15_s20   ;;  %s664_s19 = sphi %s703_s19, %s804_s19   ;;  %s660_s18 = sphi %s701_s18, %s803_s18  }
   0x3   : > { %p29_p1 = scmp.ge.s32.totalorder %s27_s21, 2  ;;  %p206_p2 = scmp.lt.s32.totalorder %s668_s20, 3 }
   0x5   : > { %s806_s21 = smov (%p29_p1, %s27_s21), 0  ;;  %p207_p3 = pnand %p576_p0, %p206_p2 }
   0x6   : > { %p240_p4 = scmp.lt.s32.totalorder (!%p207_p3), %s660_s18, 1 }
   0x7   : > { %210 = sbr.rel (%p207_p3) target bundleno = 284 (0x11c), region = 40 }
   0xc   : > { %v642_v0 = vld [vmem:[%s798_s1] sm:$0xff]   ;;  %vm327_vm0 = vcmask 523264   ;;  %s808_s18 = smov (!%p240_p4, %s660_s18), 1  ;;  %v271_v2 = vld [vmem:[%s799_s2 + $0x10] sm:$0xff]  ;;  %v670_v3 = vmov 0   ;;  %v270_v4 = vld [vmem:[%s799_s2 + $0x8] sm:$0xff] }
   0xd   : > { %607 = vmatprep.mubr.msk.bf16.mxu0 %vm327_vm0, %v642_v0  ;;  %v269_v1 = vld [vmem:[%s799_s2] sm:$0xff]  ;;  %636 = vset.pattern.permute.xlu0 %v670_v3  ;;  %s591_s28 = sshll.u32 %s808_s18, 5  ;;  %v272_v5 = vld [vmem:[%s799_s2 + $0x18] sm:$0xff]  ;;  %v430_v10 = vld [vmem:[%s800_s3 + $0x8] sm:$0xff]  ;;  %vm383_vm1 = vcmask 130048  }
   0xe   : > { %637 = vset.pattern.permute.xlu1 %v670_v3  ;;  %275 = vperm.xlu0 %636, %v269_v1   ;;  %s247_s6 = scalar_lea.vmem %s797_s0, %s591_s28  ;;  %v429_v8 = vld [vmem:[%s800_s3] sm:$0xff]  ;;  %v431_v11 = vld [vmem:[%s800_s3 + $0x10] sm:$0xff]  ;;  %v432_v13 = vld [vmem:[%s800_s3 + $0x18] sm:$0xff]  ;;  %s255_s11 = scalar_lea.vmem %s802_s5, %s591_s28 }
   0xf   : > { %285 = vperm.xlu1 %637, %v271_v2   ;;  %v638_v6 = vld [vmem:[%s247_s6 + $0x18] sm:$0xff]   ;;  %v639_v7 = vld [vmem:[%s247_s6 + $0x10] sm:$0xff]   ;;  %v640_v9 = vld [vmem:[%s247_s6 + $0x8] sm:$0xff]  }
  0x10   : > { %599 = vmatprep.subr.bf16.mxu0 %v638_v6  ;;  %v641_v12 = vld [vmem:[%s247_s6] sm:$0xff]   ;;  %v458_v15 = vld [vmem:[%s801_s4 + $0x8] sm:$0xff]  ;;  %v459_v17 = vld [vmem:[%s801_s4 + $0x10] sm:$0xff] }
  0x11   : > { %600 = vmatpush3.bf16.msra.mxu0 %v638_v6  ;;  %v457_v14 = vld [vmem:[%s801_s4] sm:$0xff]  ;;  %v643_v16 = vld [vmem:[%s798_s1 + $0x8] sm:$0xff]   ;;  %v460_v18 = vld [vmem:[%s801_s4 + $0x18] sm:$0xff] }
  0x12   : > { %280 = vperm.xlu0 %636, %v270_v4   ;;  %601 = vmatprep.subr.bf16.mxu0 %v639_v7 }
  0x13   : > { %290 = vperm.xlu1 %637, %v272_v5  }
  0x15   : > { %602 = vmatpush3.bf16.msra.mxu0 %v639_v7 }
  0x16   : > { %435 = vperm.xlu0 %636, %v429_v8   ;;  %603 = vmatprep.subr.bf16.mxu0 %v640_v9 }
  0x17   : > { %440 = vperm.xlu1 %637, %v430_v10  }
  0x19   : > { %604 = vmatpush3.bf16.msra.mxu0 %v640_v9 }
  0x1a   : > { %445 = vperm.xlu0 %636, %v431_v11   ;;  %605 = vmatprep.subr.bf16.mxu0 %v641_v12 }
  0x1b   : > { %450 = vperm.xlu1 %637, %v432_v13  }
  0x1d   : > { %606 = vmatpush3.bf16.msra.mxu0 %v641_v12 }
  0x1e   : > { %463 = vperm.xlu0 %636, %v457_v14  }
  0x1f   : > { %468 = vperm.xlu1 %637, %v458_v15  }
  0x20   : > { %608 = vmatmul.mubr.msk.bf16.vlgmr.msra.gmra.mxu0 %vm327_vm0, %v643_v16 }
  0x22   : > { %473 = vperm.xlu0 %636, %v459_v17  }
  0x23   : > { %478 = vperm.xlu1 %637, %v460_v18  }
  0x89   : > { %v276_v19 = vpop.permute.xlu0 %275 }
  0x8a   : > { %v286_v20 = vpop.permute.xlu1 %285 }
  0x8d   : > { %v281_v25 = vpop.permute.xlu0 %280 }
  0x8e   : > { %v291_v27 = vpop.permute.xlu1 %290 }
  0x91   : > { %v436_v3 = vpop.permute.xlu0 %435 }
  0x92   : > { %v441_v4 = vpop.permute.xlu1 %440 }
  0x95   : > { %v446_v5 = vpop.permute.xlu0 %445 }
  0x96   : > { %v451_v6 = vpop.permute.xlu1 %450 }
  0x99   : > { %v464_v7 = vpop.permute.xlu0 %463 }
  0x9a   : > { %v469_v8 = vpop.permute.xlu1 %468 }
  0xe0   : > { %v609_v21 = vpop.f32.mrf.mxu0 }
  0xe1   : > { %v377_v26 = vadd.f32 %v609_v21, %v286_v20 }
  0xe2   : > { %v368_v22 = vpop.f32.mrf.mxu0 }
  0xe3   : > { %v369_v23 = vadd.f32 %v368_v22, %v276_v19  ;;  %v400_v32 = vmul.f32 %v377_v26, %v377_v26  ;;  %v387_v37 = vsel %vm383_vm1, %v377_v26, 0.0  ;;  %v474_v22 = vpop.permute.xlu0 %473 }
  0xe4   : > { %v610_v24 = vpop.f32.mrf.mxu0 }
  0xe5   : > { %v398_v29 = vmul.f32 %v369_v23, %v369_v23  ;;  %v380_v30 = vadd.f32 %v610_v24, %v291_v27  ;;  %v384_v33 = vsel %vm383_vm1, %v369_v23, 0.0  ;;  %v405_v43 = vsel %vm383_vm1, %v400_v32, 0.0  ;;  %v479_v24 = vpop.permute.xlu1 %478 }
  0xe6   : > { %v371_v28 = vpop.f32.mrf.mxu0 }
  0xe7   : > { %v372_v31 = vadd.f32 %v371_v28, %v281_v25  ;;  %v402_v38 = vsel %vm383_vm1, %v398_v29, 0.0  ;;  %v401_v39 = vmul.f32 %v380_v30, %v380_v30  ;;  %v389_v44 = vsel %vm383_vm1, %v380_v30, 0.0 }
  0xe9   : > { %v385_v34 = vsel %vm383_vm1, %v372_v31, 0.0  ;;  %v399_v35 = vmul.f32 %v372_v31, %v372_v31  ;;  %v407_v47 = vsel %vm383_vm1, %v401_v39, 0.0 }
  0xea   : > { %v386_v36 = vadd.f32 %v385_v34, %v384_v33 }
  0xeb   : > { %v403_v40 = vsel %vm383_vm1, %v399_v35, 0.0 }
  0xec   : > { %v388_v41 = vadd.f32 %v387_v37, %v386_v36  ;;  %v404_v42 = vadd.f32 %v403_v40, %v402_v38 }
  0xee   : > { %v390_v45 = vadd.f32 %v389_v44, %v388_v41  ;;  %v406_v46 = vadd.f32 %v405_v43, %v404_v42 }
  0xf0   : > { %v391_v48 = vrot.slane %v390_v45, 4  ;;  %v408_v49 = vadd.f32 %v407_v47, %v406_v46 }
  0xf2   : > { %v392_v50 = vadd.f32 %v391_v48, %v390_v45  ;;  %v409_v51 = vrot.slane %v408_v49, 4 }
  0xf4   : > { %v393_v52 = vrot.slane %v392_v50, 2  ;;  %v410_v53 = vadd.f32 %v409_v51, %v408_v49 }
  0xf6   : > { %v394_v54 = vadd.f32 %v393_v52, %v392_v50  ;;  %v411_v55 = vrot.slane %v410_v53, 2 }
  0xf8   : > { %v395_v56 = vrot.slane %v394_v54, 1  ;;  %v412_v57 = vadd.f32 %v411_v55, %v410_v53 }
  0xfa   : > { %v396_v58 = vadd.f32 %v395_v56, %v394_v54  ;;  %v413_v59 = vrot.slane %v412_v57, 1 }
  0xfc   : > { %v397_v60 = vmul.f32 0.03125, %v396_v58  ;;  %v414_v61 = vadd.f32 %v413_v59, %v412_v57 }
  0xfe   : > { %v415_v62 = vmul.f32 0.03125, %v414_v61  ;;  %v416_v63 = vmul.f32 %v397_v60, %v397_v60  ;;  %v419_v9 = vsub.f32 %v369_v23, %v397_v60  ;;  %v420_v10 = vsub.f32 %v372_v31, %v397_v60 }
  0xff   : > { %v421_v11 = vsub.f32 %v377_v26, %v397_v60  ;;  %v422_v12 = vsub.f32 %v380_v30, %v397_v60 }
 0x100   : > { %v417_v0 = vsub.f32 %v415_v62, %v416_v63 }
 0x102   : > { %v418_v1 = vmax.f32 %v417_v0, 0.0 }
 0x104   : > { %v423_v2 = vadd.f32 1e-06, %v418_v1 }
 0x106   : > { %644 = vrsqrt.f32 %v423_v2 }
 0x113   : > { %v645_v13 = vpop.eup %644 }
 0x114   : > { %v425_v14 = vmul.f32 %v645_v13, %v419_v9  ;;  %v426_v15 = vmul.f32 %v645_v13, %v420_v10  ;;  %v427_v16 = vmul.f32 %v645_v13, %v421_v11  ;;  %v428_v17 = vmul.f32 %v645_v13, %v422_v12 }
 0x116   : > { %v453_v18 = vmul.f32 %v436_v3, %v425_v14  ;;  %v454_v19 = vmul.f32 %v441_v4, %v426_v15  ;;  %v455_v20 = vmul.f32 %v446_v5, %v427_v16  ;;  %v456_v21 = vmul.f32 %v451_v6, %v428_v17 }
 0x118   : > { %v481_v23 = vadd.f32 %v464_v7, %v453_v18  ;;  %v482_v25 = vadd.f32 %v469_v8, %v454_v19  ;;  %v483_v26 = vadd.f32 %v474_v22, %v455_v20  ;;  %v484_v27 = vadd.f32 %v479_v24, %v456_v21 }
 0x11a   : > { %485 = vst.msk [vmem:[%s255_s11] sm:$0xff] %vm383_vm1, %v481_v23  ;;  %486 = vst.msk [vmem:[%s255_s11 + $0x8] sm:$0xff] %vm383_vm1, %v482_v25 }
 0x11b   : > { %487 = vst.msk [vmem:[%s255_s11 + $0x10] sm:$0xff] %vm383_vm1, %v483_v26  ;;  %488 = vst.msk [vmem:[%s255_s11 + $0x18] sm:$0xff] %vm383_vm1, %v484_v27 }
 0x11c PF: > { %s15_s20 = sadd.s32 1, %s668_s20   ;;  %s803_s18 = smov %s664_s19 }
 0x11d   : > { %p12_p5 = scmp.ge.s32.totalorder %s15_s20, 4   ;;  %s804_s19 = smov %s806_s21 }
 0x11f   :  { %14 = sbr.rel (!%p12_p5) target bundleno = 2 (0x2), region = 70 }

</bundles_post_ra>
